<compile_context>
chip_gen: v5e
topology: v5e:2x2
jax: 0.10.0
libtpu: 0.0.40
codegen_flags: <defaults>
</compile_context>

<pallas_src>
import functools

import jax
import jax.numpy as jnp
import numpy as np
from jax.experimental import pallas as pl
from jax.experimental.pallas import tpu as pltpu


# ----------------------------- Pallas kernel -------------------------------

def _downsample_kernel(x_ref, r1_ref, r2_ref, b1_ref, b2_ref, sel_ref,
                       down_ref, pool_ref, *, H):
    """Fused DoubleConv + 2x2/2 MaxPool for one block of Bb images.

    x_ref    : (M, W*Cin)           activation slab, M = Bb*H (batch folded)
    r1_ref   : (3, W*Cin,  W*Cout)  conv1 weights folded per kernel row kh
    r2_ref   : (3, W*Cout, W*Cout)  conv2 weights folded per kernel row kh
    b1_ref   : (1, W*Cout)          bias tiled across W
    b2_ref   : (1, W*Cout)
    sel_ref  : (2, W*Cout, Wh*Cout) even/odd output-column selectors (pool)
    down_ref : (M, W*Cout)
    pool_ref : (M//4, 2*Wh*Cout)    two pooled rows packed per lane row
    """
    f32 = jnp.float32
    x = x_ref[...]
    M = x.shape[0]

    # Per-image row index (batch is folded into the row axis); used to zero
    # the rolled-in rows at each image's top/bottom edge ('same' padding) and
    # to kill the wrap-around across image boundaries.
    row = jax.lax.broadcasted_iota(jnp.int32, (M, 1), 0) % H
    is_top = row == 0
    is_bot = row == H - 1

    def conv3x3(xin, r_ref, b_ref):
        # One matmul per kernel row kh; the kx column shift / channel mixing
        # is folded into R[kh] on the host.
        t0 = jnp.dot(xin, r_ref[0], preferred_element_type=f32)  # kh=0 (y-1)
        t1 = jnp.dot(xin, r_ref[1], preferred_element_type=f32)  # kh=1 (y)
        t2 = jnp.dot(xin, r_ref[2], preferred_element_type=f32)  # kh=2 (y+1)
        # Row shift on the XLU (sublane roll), zeroed at image edges.
        c0 = jnp.where(is_top, 0.0, pltpu.roll(t0, 1, axis=0))      # t0[y-1]
        c2 = jnp.where(is_bot, 0.0, pltpu.roll(t2, M - 1, axis=0))  # t2[y+1]
        return jnp.maximum(t1 + c0 + c2 + b_ref[...], 0.0)          # bias+ReLU

    h1 = conv3x3(x, r1_ref, b1_ref)         # (M, W*Cout) -- stays in VMEM
    down = conv3x3(h1, r2_ref, b2_ref)      # (M, W*Cout)
    down_ref[...] = down.astype(down_ref.dtype)   # lane-dense (128) store

    # ---- 2x2 / stride-2 max pool ----
    # Row pairs: strided sublane reads of the just-written tile + VPU max.
    # Column pairs: 0/1 selection matmuls (no lane shuffles).
    # Pack pooled rows (2p, 2p+1) side-by-side -> full 128-lane store.
    Mq = M // 4
    d0 = down_ref[pl.ds(0, Mq, stride=4), :]   # rows 4p
    d1 = down_ref[pl.ds(1, Mq, stride=4), :]   # rows 4p+1
    d2 = down_ref[pl.ds(2, Mq, stride=4), :]   # rows 4p+2
    d3 = down_ref[pl.ds(3, Mq, stride=4), :]   # rows 4p+3
    m01 = jnp.maximum(d0, d1)                  # -> pooled row 2p
    m23 = jnp.maximum(d2, d3)                  # -> pooled row 2p+1
    top = jnp.maximum(jnp.dot(m01, sel_ref[0], preferred_element_type=f32),
                      jnp.dot(m01, sel_ref[1], preferred_element_type=f32))
    bot = jnp.maximum(jnp.dot(m23, sel_ref[0], preferred_element_type=f32),
                      jnp.dot(m23, sel_ref[1], preferred_element_type=f32))
    pool_ref[...] = jnp.concatenate([top, bot], axis=-1).astype(pool_ref.dtype)


# --------------------------- weight preprocessing ---------------------------

def _build_conv_rmats(w, W):
    """PyTorch Conv2d weight (Cout, Cin, 3, 3) -> (3, W*Cin, W*Cout).

    R[kh][w_idx*Cin+ci, x*Cout+co] = w[co, ci, kh, (w_idx-x)+1] if |w_idx-x|<=1,
    so (X @ R[kh])[r, x*Cout+co] is the full (kx, ci) contraction of kernel
    row kh at output column x, evaluated with input row r.
    """
    Cout, Cin, _, _ = w.shape
    S = np.stack([np.eye(W, k=1 - k, dtype=np.float32) for k in range(3)])
    R = jnp.einsum('kab,oiyk->yaibo', jnp.asarray(S), w.astype(jnp.float32))
    return R.reshape(3, W * Cin, W * Cout)


def _pick_batch_block(B, max_block=8):
    for cand in range(min(B, max_block), 0, -1):
        if B % cand == 0:
            return cand
    return 1


# ------------------------------ forward wrapper -----------------------------

def downsample_forward(x_nchw, w1, b1, w2, b2, *, batch_block=None):
    """Matches DownSample.forward: returns (down, p), both NCHW float32."""
    B, Cin, H, W = x_nchw.shape
    Cout = w1.shape[0]
    assert H % 2 == 0 and W % 2 == 0, "pool stage assumes even H, W"
    Hh, Wh = H // 2, W // 2
    f32 = jnp.float32

    Bb = batch_block if batch_block is not None else _pick_batch_block(B)
    assert B % Bb == 0
    M = Bb * H
    assert (Bb * Hh) % 2 == 0, "need an even number of pooled rows per step"

    NC = W * Cout            # conv output lane width (128 at demo shapes)
    PC = Wh * Cout           # pooled row width before packing

    # Layout plumbing: NCHW -> lane-dense (B*H, W*Cin) slab.  The surrounding
    # transposes are pure layout traffic; keep the model NHWC to drop them.
    x2d = jnp.transpose(x_nchw, (0, 2, 3, 1)).reshape(B * H, W * Cin).astype(f32)

    # Folded conv weights, biases, pool column selectors (tiny constants).
    R1 = _build_conv_rmats(w1, W)                        # (3, W*Cin,  W*Cout)
    R2 = _build_conv_rmats(w2, W)                        # (3, W*Cout, W*Cout)
    b1row = jnp.tile(b1.astype(f32), W).reshape(1, NC)
    b2row = jnp.tile(b2.astype(f32), W).reshape(1, NC)
    SelE = np.kron(np.kron(np.eye(Wh), np.array([[1.0], [0.0]])), np.eye(Cout))
    SelO = np.kron(np.kron(np.eye(Wh), np.array([[0.0], [1.0]])), np.eye(Cout))
    Spool = jnp.asarray(np.stack([SelE, SelO]).astype(np.float32))  # (2,NC,PC)

    def const_spec(shape):
        zeros = (0,) * len(shape)
        return pl.BlockSpec(shape, lambda i, _z=zeros: _z)

    kernel = functools.partial(_downsample_kernel, H=H)

    down2d, pool2d = pl.pallas_call(
        kernel,
        out_shape=(jax.ShapeDtypeStruct((B * H, NC), f32),
                   jax.ShapeDtypeStruct((B * Hh // 2, 2 * PC), f32)),
        grid_spec=pltpu.PrefetchScalarGridSpec(
            num_scalar_prefetch=0,
            grid=(B // Bb,),
            in_specs=[pl.BlockSpec((M, W * Cin), lambda i: (i, 0)),
                      const_spec((3, W * Cin, NC)),
                      const_spec((3, NC, NC)),
                      const_spec((1, NC)),
                      const_spec((1, NC)),
                      const_spec((2, NC, PC))],
            out_specs=(pl.BlockSpec((M, NC), lambda i: (i, 0)),
                       pl.BlockSpec((Bb * Hh // 2, 2 * PC), lambda i: (i, 0))),
        ),
        compiler_params=pltpu.CompilerParams(
            dimension_semantics=("parallel",)),   # batch blocks across TCs
    )(x2d, R1, R2, b1row, b2row, Spool)

    down = jnp.transpose(down2d.reshape(B, H, W, Cout), (0, 3, 1, 2))
    # Packed pooled slab is row-major identical to (B, Hh, Wh, Cout).
    pooled = jnp.transpose(pool2d.reshape(B, Hh, Wh, Cout), (0, 3, 1, 2))
    return down, pooled


# --------------------------- reference (pure JAX) ---------------------------

def _ref_forward(x_nchw, w1, b1, w2, b2):
    x = jnp.transpose(x_nchw, (0, 2, 3, 1)).astype(jnp.float32)   # NHWC

    def conv(xin, w, b):
        y = jax.lax.conv_general_dilated(
            xin, w.astype(jnp.float32), window_strides=(1, 1), padding='SAME',
            dimension_numbers=('NHWC', 'OIHW', 'NHWC'),
            precision=jax.lax.Precision.HIGHEST)
        return jnp.maximum(y + b[None, None, None, :], 0.0)

    h1 = conv(x, w1, b1)
    d = conv(h1, w2, b2)
    B, H, W, C = d.shape
    p = d.reshape(B, H // 2, 2, W // 2, 2, C).max(axis=(2, 4))
    return jnp.transpose(d, (0, 3, 1, 2)), jnp.transpose(p, (0, 3, 1, 2))


# ---------------------------------- main ------------------------------------

if __name__ == "__main__":
    B, Cin, Cout, H, W = 2, 4, 8, 16, 16

    key = jax.random.PRNGKey(0)
    kx, k1, k2, k3, k4 = jax.random.split(key, 5)

    x = jax.random.normal(kx, (B, Cin, H, W), dtype=jnp.float32)

    # Deterministic parameter init (Conv2d shapes from the module's __init__).
    w1 = jax.random.normal(k1, (Cout, Cin, 3, 3), jnp.float32) * (2.0 / (Cin * 9)) ** 0.5
    b1 = jax.random.normal(k2, (Cout,), jnp.float32) * 0.01
    w2 = jax.random.normal(k3, (Cout, Cout, 3, 3), jnp.float32) * (2.0 / (Cout * 9)) ** 0.5
    b2 = jax.random.normal(k4, (Cout,), jnp.float32) * 0.01

    fwd = jax.jit(downsample_forward)
    down, p = fwd(x, w1, b1, w2, b2)
    jax.block_until_ready((down, p))

    assert down.shape == (B, Cout, H, W), down.shape
    assert p.shape == (B, Cout, H // 2, W // 2), p.shape

    down_ref, p_ref = _ref_forward(x, w1, b1, w2, b2)
    # Conv path: DEFAULT-precision in-kernel matmuls vs HIGHEST-precision ref.
    np.testing.assert_allclose(np.asarray(down), np.asarray(down_ref),
                               rtol=2e-2, atol=2e-2)
    np.testing.assert_allclose(np.asarray(p), np.asarray(p_ref),
                               rtol=2e-2, atol=2e-2)

    # Pool-wiring check (independent of conv matmul precision): the pooled
    # output must equal the 2x2 max-pool of the kernel's own `down` output up
    # to the bf16 rounding of the 0/1 column-selection matmul.
    d = np.asarray(down)
    p_from_down = d.reshape(B, Cout, H // 2, 2, W // 2, 2).max(axis=(3, 5))
    np.testing.assert_allclose(np.asarray(p), p_from_down, rtol=5e-3, atol=5e-3)

    print("KERNEL_OK")
</pallas_src>

<mosaic_0001>
module attributes {stable_mosaic.version = 11 : i64} {
  func.func @_downsample_kernel(%arg0: i32, %arg1: memref<32x64xf32, #tpu.memory_space<vmem>>, %arg2: memref<3x64x128xf32, #tpu.memory_space<vmem>>, %arg3: memref<3x128x128xf32, #tpu.memory_space<vmem>>, %arg4: memref<1x128xf32, #tpu.memory_space<vmem>>, %arg5: memref<1x128xf32, #tpu.memory_space<vmem>>, %arg6: memref<2x128x64xf32, #tpu.memory_space<vmem>>, %arg7: memref<32x128xf32, #tpu.memory_space<vmem>>, %arg8: memref<8x128xf32, #tpu.memory_space<vmem>>) attributes {dimension_semantics = [#tpu.dimension_semantics<parallel>], iteration_bounds = array<i64: 1>, scalar_prefetch = 0 : i64, scratch_operands = 0 : i64, tpu.core_type = #tpu.core_type<tc>, window_params = [{transform_indices = @transform_0, window_bounds = array<i64: 32, 64>}, {pipeline_mode = #tpu.pipeline_mode<synchronous>, transform_indices = @transform_1, window_bounds = array<i64: 3, 64, 128>}, {pipeline_mode = #tpu.pipeline_mode<synchronous>, transform_indices = @transform_2, window_bounds = array<i64: 3, 128, 128>}, {pipeline_mode = #tpu.pipeline_mode<synchronous>, transform_indices = @transform_3, window_bounds = array<i64: 1, 128>}, {pipeline_mode = #tpu.pipeline_mode<synchronous>, transform_indices = @transform_4, window_bounds = array<i64: 1, 128>}, {pipeline_mode = #tpu.pipeline_mode<synchronous>, transform_indices = @transform_5, window_bounds = array<i64: 2, 128, 64>}, {transform_indices = @transform_6, window_bounds = array<i64: 32, 128>}, {transform_indices = @transform_7, window_bounds = array<i64: 8, 128>}]} {
    %c0 = arith.constant 0 : index
    %c0_0 = arith.constant 0 : index
    %0 = vector.load %arg1[%c0, %c0_0] : memref<32x64xf32, #tpu.memory_space<vmem>>, vector<32x64xf32>
    %1 = tpu.iota {dimensions = array<i32: 0>} : vector<32x1xi32>
    %c16_i32 = arith.constant 16 : i32
    %c0_i32 = arith.constant 0 : i32
    %2 = arith.cmpi eq, %c16_i32, %c0_i32 : i32
    %c1_i32 = arith.constant 1 : i32
    %3 = arith.select %2, %c1_i32, %c16_i32 : i32
    %4 = vector.broadcast %3 : i32 to vector<32x1xi32>
    %5 = arith.remsi %1, %4 : vector<32x1xi32>
    %c0_i32_1 = arith.constant 0 : i32
    %6 = vector.broadcast %c0_i32_1 : i32 to vector<32x1xi32>
    %7 = arith.cmpi ne, %5, %6 : vector<32x1xi32>
    %c0_i32_2 = arith.constant 0 : i32
    %8 = vector.broadcast %c0_i32_2 : i32 to vector<32x1xi32>
    %9 = arith.cmpi slt, %5, %8 : vector<32x1xi32>
    %c0_i32_3 = arith.constant 0 : i32
    %10 = arith.cmpi slt, %3, %c0_i32_3 : i32
    %11 = vector.broadcast %10 : i1 to vector<32x1xi1>
    %12 = vector.broadcast %11 : vector<32x1xi1> to vector<32x1xi1>
    %13 = arith.xori %9, %12 : vector<32x1xi1>
    %14 = arith.andi %13, %7 : vector<32x1xi1>
    %15 = vector.broadcast %3 : i32 to vector<32x1xi32>
    %16 = arith.addi %5, %15 : vector<32x1xi32>
    %17 = arith.select %14, %16, %5 : vector<32x1xi1>, vector<32x1xi32>
    %c0_i32_4 = arith.constant 0 : i32
    %18 = vector.broadcast %c0_i32_4 : i32 to vector<32x1xi32>
    %19 = arith.cmpi eq, %17, %18 : vector<32x1xi32>
    %c15_i32 = arith.constant 15 : i32
    %20 = vector.broadcast %c15_i32 : i32 to vector<32x1xi32>
    %21 = arith.cmpi eq, %17, %20 : vector<32x1xi32>
    %c0_5 = arith.constant 0 : index
    %c0_6 = arith.constant 0 : index
    %c0_7 = arith.constant 0 : index
    %22 = vector.load %arg2[%c0_5, %c0_6, %c0_7] : memref<3x64x128xf32, #tpu.memory_space<vmem>>, vector<1x64x128xf32>
    %23 = vector.shape_cast %22 : vector<1x64x128xf32> to vector<64x128xf32>
    %cst = arith.constant dense<0.000000e+00> : vector<32x128xf32>
    %24 = tpu.matmul %0, %23, %cst {dimension_numbers = #tpu.dot_dimension_numbers<[1], [0], [0], [1], [0, 0, 1, 1], [], []>} : vector<32x64xf32>, vector<64x128xf32>, vector<32x128xf32> -> vector<32x128xf32>
    %c1 = arith.constant 1 : index
    %c0_8 = arith.constant 0 : index
    %c0_9 = arith.constant 0 : index
    %25 = vector.load %arg2[%c1, %c0_8, %c0_9] : memref<3x64x128xf32, #tpu.memory_space<vmem>>, vector<1x64x128xf32>
    %26 = vector.shape_cast %25 : vector<1x64x128xf32> to vector<64x128xf32>
    %cst_10 = arith.constant dense<0.000000e+00> : vector<32x128xf32>
    %27 = tpu.matmul %0, %26, %cst_10 {dimension_numbers = #tpu.dot_dimension_numbers<[1], [0], [0], [1], [0, 0, 1, 1], [], []>} : vector<32x64xf32>, vector<64x128xf32>, vector<32x128xf32> -> vector<32x128xf32>
    %c2 = arith.constant 2 : index
    %c0_11 = arith.constant 0 : index
    %c0_12 = arith.constant 0 : index
    %28 = vector.load %arg2[%c2, %c0_11, %c0_12] : memref<3x64x128xf32, #tpu.memory_space<vmem>>, vector<1x64x128xf32>
    %29 = vector.shape_cast %28 : vector<1x64x128xf32> to vector<64x128xf32>
    %cst_13 = arith.constant dense<0.000000e+00> : vector<32x128xf32>
    %30 = tpu.matmul %0, %29, %cst_13 {dimension_numbers = #tpu.dot_dimension_numbers<[1], [0], [0], [1], [0, 0, 1, 1], [], []>} : vector<32x64xf32>, vector<64x128xf32>, vector<32x128xf32> -> vector<32x128xf32>
    %c1_i32_14 = arith.constant 1 : i32
    %31 = tpu.dynamic_rotate %24 by %c1_i32_14 dim 0 : vector<32x128xf32>, i32 -> vector<32x128xf32>
    %cst_15 = arith.constant 0.000000e+00 : f32
    %32 = vector.shape_cast %19 : vector<32x1xi1> to vector<32x1xi1>
    %33 = vector.broadcast %32 : vector<32x1xi1> to vector<32x128xi1>
    %34 = vector.broadcast %cst_15 : f32 to vector<32x128xf32>
    %35 = arith.select %33, %34, %31 : vector<32x128xi1>, vector<32x128xf32>
    %c31_i32 = arith.constant 31 : i32
    %36 = tpu.dynamic_rotate %30 by %c31_i32 dim 0 : vector<32x128xf32>, i32 -> vector<32x128xf32>
    %cst_16 = arith.constant 0.000000e+00 : f32
    %37 = vector.shape_cast %21 : vector<32x1xi1> to vector<32x1xi1>
    %38 = vector.broadcast %37 : vector<32x1xi1> to vector<32x128xi1>
    %39 = vector.broadcast %cst_16 : f32 to vector<32x128xf32>
    %40 = arith.select %38, %39, %36 : vector<32x128xi1>, vector<32x128xf32>
    %41 = arith.addf %27, %35 : vector<32x128xf32>
    %42 = arith.addf %41, %40 : vector<32x128xf32>
    %c0_17 = arith.constant 0 : index
    %c0_18 = arith.constant 0 : index
    %43 = vector.load %arg4[%c0_17, %c0_18] : memref<1x128xf32, #tpu.memory_space<vmem>>, vector<1x128xf32>
    %44 = vector.broadcast %43 : vector<1x128xf32> to vector<32x128xf32>
    %45 = arith.addf %42, %44 : vector<32x128xf32>
    %cst_19 = arith.constant 0.000000e+00 : f32
    %46 = vector.broadcast %cst_19 : f32 to vector<32x128xf32>
    %47 = arith.maximumf %45, %46 : vector<32x128xf32>
    %c0_20 = arith.constant 0 : index
    %c0_21 = arith.constant 0 : index
    %c0_22 = arith.constant 0 : index
    %48 = vector.load %arg3[%c0_20, %c0_21, %c0_22] : memref<3x128x128xf32, #tpu.memory_space<vmem>>, vector<1x128x128xf32>
    %49 = vector.shape_cast %48 : vector<1x128x128xf32> to vector<128x128xf32>
    %cst_23 = arith.constant dense<0.000000e+00> : vector<32x128xf32>
    %50 = tpu.matmul %47, %49, %cst_23 {dimension_numbers = #tpu.dot_dimension_numbers<[1], [0], [0], [1], [0, 0, 1, 1], [], []>} : vector<32x128xf32>, vector<128x128xf32>, vector<32x128xf32> -> vector<32x128xf32>
    %c1_24 = arith.constant 1 : index
    %c0_25 = arith.constant 0 : index
    %c0_26 = arith.constant 0 : index
    %51 = vector.load %arg3[%c1_24, %c0_25, %c0_26] : memref<3x128x128xf32, #tpu.memory_space<vmem>>, vector<1x128x128xf32>
    %52 = vector.shape_cast %51 : vector<1x128x128xf32> to vector<128x128xf32>
    %cst_27 = arith.constant dense<0.000000e+00> : vector<32x128xf32>
    %53 = tpu.matmul %47, %52, %cst_27 {dimension_numbers = #tpu.dot_dimension_numbers<[1], [0], [0], [1], [0, 0, 1, 1], [], []>} : vector<32x128xf32>, vector<128x128xf32>, vector<32x128xf32> -> vector<32x128xf32>
    %c2_28 = arith.constant 2 : index
    %c0_29 = arith.constant 0 : index
    %c0_30 = arith.constant 0 : index
    %54 = vector.load %arg3[%c2_28, %c0_29, %c0_30] : memref<3x128x128xf32, #tpu.memory_space<vmem>>, vector<1x128x128xf32>
    %55 = vector.shape_cast %54 : vector<1x128x128xf32> to vector<128x128xf32>
    %cst_31 = arith.constant dense<0.000000e+00> : vector<32x128xf32>
    %56 = tpu.matmul %47, %55, %cst_31 {dimension_numbers = #tpu.dot_dimension_numbers<[1], [0], [0], [1], [0, 0, 1, 1], [], []>} : vector<32x128xf32>, vector<128x128xf32>, vector<32x128xf32> -> vector<32x128xf32>
    %c1_i32_32 = arith.constant 1 : i32
    %57 = tpu.dynamic_rotate %50 by %c1_i32_32 dim 0 : vector<32x128xf32>, i32 -> vector<32x128xf32>
    %cst_33 = arith.constant 0.000000e+00 : f32
    %58 = vector.shape_cast %19 : vector<32x1xi1> to vector<32x1xi1>
    %59 = vector.broadcast %58 : vector<32x1xi1> to vector<32x128xi1>
    %60 = vector.broadcast %cst_33 : f32 to vector<32x128xf32>
    %61 = arith.select %59, %60, %57 : vector<32x128xi1>, vector<32x128xf32>
    %c31_i32_34 = arith.constant 31 : i32
    %62 = tpu.dynamic_rotate %56 by %c31_i32_34 dim 0 : vector<32x128xf32>, i32 -> vector<32x128xf32>
    %cst_35 = arith.constant 0.000000e+00 : f32
    %63 = vector.shape_cast %21 : vector<32x1xi1> to vector<32x1xi1>
    %64 = vector.broadcast %63 : vector<32x1xi1> to vector<32x128xi1>
    %65 = vector.broadcast %cst_35 : f32 to vector<32x128xf32>
    %66 = arith.select %64, %65, %62 : vector<32x128xi1>, vector<32x128xf32>
    %67 = arith.addf %53, %61 : vector<32x128xf32>
    %68 = arith.addf %67, %66 : vector<32x128xf32>
    %c0_36 = arith.constant 0 : index
    %c0_37 = arith.constant 0 : index
    %69 = vector.load %arg5[%c0_36, %c0_37] : memref<1x128xf32, #tpu.memory_space<vmem>>, vector<1x128xf32>
    %70 = vector.broadcast %69 : vector<1x128xf32> to vector<32x128xf32>
    %71 = arith.addf %68, %70 : vector<32x128xf32>
    %cst_38 = arith.constant 0.000000e+00 : f32
    %72 = vector.broadcast %cst_38 : f32 to vector<32x128xf32>
    %73 = arith.maximumf %71, %72 : vector<32x128xf32>
    %c0_39 = arith.constant 0 : index
    %c0_40 = arith.constant 0 : index
    %74 = vector.load %arg7[%c0_39, %c0_40] : memref<32x128xf32, #tpu.memory_space<vmem>>, vector<32x128xf32>
    tpu.vector_store %arg7[%c0_39, %c0_40], %73 {strides = array<i32>} : memref<32x128xf32, #tpu.memory_space<vmem>>, vector<32x128xf32>,
    %c0_41 = arith.constant 0 : index
    %c0_42 = arith.constant 0 : index
    %75 = tpu.strided_load %arg7[%c0_41, %c0_42] {strides = array<i32: 4, 1>} : memref<32x128xf32, #tpu.memory_space<vmem>>, vector<8x128xf32>
    %c1_43 = arith.constant 1 : index
    %c0_44 = arith.constant 0 : index
    %76 = tpu.strided_load %arg7[%c1_43, %c0_44] {strides = array<i32: 4, 1>} : memref<32x128xf32, #tpu.memory_space<vmem>>, vector<8x128xf32>
    %c2_45 = arith.constant 2 : index
    %c0_46 = arith.constant 0 : index
    %77 = tpu.strided_load %arg7[%c2_45, %c0_46] {strides = array<i32: 4, 1>} : memref<32x128xf32, #tpu.memory_space<vmem>>, vector<8x128xf32>
    %c3 = arith.constant 3 : index
    %c0_47 = arith.constant 0 : index
    %78 = tpu.strided_load %arg7[%c3, %c0_47] {strides = array<i32: 4, 1>} : memref<32x128xf32, #tpu.memory_space<vmem>>, vector<8x128xf32>
    %79 = arith.maximumf %75, %76 : vector<8x128xf32>
    %80 = arith.maximumf %77, %78 : vector<8x128xf32>
    %c0_48 = arith.constant 0 : index
    %c0_49 = arith.constant 0 : index
    %c0_50 = arith.constant 0 : index
    %81 = vector.load %arg6[%c0_48, %c0_49, %c0_50] : memref<2x128x64xf32, #tpu.memory_space<vmem>>, vector<1x128x64xf32>
    %82 = vector.shape_cast %81 : vector<1x128x64xf32> to vector<128x64xf32>
    %cst_51 = arith.constant dense<0.000000e+00> : vector<8x64xf32>
    %83 = tpu.matmul %79, %82, %cst_51 {dimension_numbers = #tpu.dot_dimension_numbers<[1], [0], [0], [1], [0, 0, 1, 1], [], []>} : vector<8x128xf32>, vector<128x64xf32>, vector<8x64xf32> -> vector<8x64xf32>
    %c1_52 = arith.constant 1 : index
    %c0_53 = arith.constant 0 : index
    %c0_54 = arith.constant 0 : index
    %84 = vector.load %arg6[%c1_52, %c0_53, %c0_54] : memref<2x128x64xf32, #tpu.memory_space<vmem>>, vector<1x128x64xf32>
    %85 = vector.shape_cast %84 : vector<1x128x64xf32> to vector<128x64xf32>
    %cst_55 = arith.constant dense<0.000000e+00> : vector<8x64xf32>
    %86 = tpu.matmul %79, %85, %cst_55 {dimension_numbers = #tpu.dot_dimension_numbers<[1], [0], [0], [1], [0, 0, 1, 1], [], []>} : vector<8x128xf32>, vector<128x64xf32>, vector<8x64xf32> -> vector<8x64xf32>
    %87 = arith.maximumf %83, %86 : vector<8x64xf32>
    %c0_56 = arith.constant 0 : index
    %c0_57 = arith.constant 0 : index
    %c0_58 = arith.constant 0 : index
    %88 = vector.load %arg6[%c0_56, %c0_57, %c0_58] : memref<2x128x64xf32, #tpu.memory_space<vmem>>, vector<1x128x64xf32>
    %89 = vector.shape_cast %88 : vector<1x128x64xf32> to vector<128x64xf32>
    %cst_59 = arith.constant dense<0.000000e+00> : vector<8x64xf32>
    %90 = tpu.matmul %80, %89, %cst_59 {dimension_numbers = #tpu.dot_dimension_numbers<[1], [0], [0], [1], [0, 0, 1, 1], [], []>} : vector<8x128xf32>, vector<128x64xf32>, vector<8x64xf32> -> vector<8x64xf32>
    %c1_60 = arith.constant 1 : index
    %c0_61 = arith.constant 0 : index
    %c0_62 = arith.constant 0 : index
    %91 = vector.load %arg6[%c1_60, %c0_61, %c0_62] : memref<2x128x64xf32, #tpu.memory_space<vmem>>, vector<1x128x64xf32>
    %92 = vector.shape_cast %91 : vector<1x128x64xf32> to vector<128x64xf32>
    %cst_63 = arith.constant dense<0.000000e+00> : vector<8x64xf32>
    %93 = tpu.matmul %80, %92, %cst_63 {dimension_numbers = #tpu.dot_dimension_numbers<[1], [0], [0], [1], [0, 0, 1, 1], [], []>} : vector<8x128xf32>, vector<128x64xf32>, vector<8x64xf32> -> vector<8x64xf32>
    %94 = arith.maximumf %90, %93 : vector<8x64xf32>
    %95 = tpu.concatenate %87, %94 in 1 : vector<8x64xf32>, vector<8x64xf32> -> vector<8x128xf32>
    %c0_64 = arith.constant 0 : index
    %c0_65 = arith.constant 0 : index
    %96 = vector.load %arg8[%c0_64, %c0_65] : memref<8x128xf32, #tpu.memory_space<vmem>>, vector<8x128xf32>
    tpu.vector_store %arg8[%c0_64, %c0_65], %95 {strides = array<i32>} : memref<8x128xf32, #tpu.memory_space<vmem>>, vector<8x128xf32>,
    return
  }
  func.func @transform_0(%arg0: i32) -> (i32, i32) {
    %c0_i32 = arith.constant 0 : i32
    %c0_i32_0 = arith.constant 0 : i32
    return %arg0, %c0_i32 : i32, i32
  }
  func.func @transform_1(%arg0: i32) -> (i32, i32, i32) {
    %c0_i32 = arith.constant 0 : i32
    %c0_i32_0 = arith.constant 0 : i32
    %c0_i32_1 = arith.constant 0 : i32
    %c0_i32_2 = arith.constant 0 : i32
    return %c0_i32, %c0_i32_0, %c0_i32_1 : i32, i32, i32
  }
  func.func @transform_2(%arg0: i32) -> (i32, i32, i32) {
    %c0_i32 = arith.constant 0 : i32
    %c0_i32_0 = arith.constant 0 : i32
    %c0_i32_1 = arith.constant 0 : i32
    %c0_i32_2 = arith.constant 0 : i32
    return %c0_i32, %c0_i32_0, %c0_i32_1 : i32, i32, i32
  }
  func.func @transform_3(%arg0: i32) -> (i32, i32) {
    %c0_i32 = arith.constant 0 : i32
    %c0_i32_0 = arith.constant 0 : i32
    %c0_i32_1 = arith.constant 0 : i32
    return %c0_i32, %c0_i32_0 : i32, i32
  }
  func.func @transform_4(%arg0: i32) -> (i32, i32) {
    %c0_i32 = arith.constant 0 : i32
    %c0_i32_0 = arith.constant 0 : i32
    %c0_i32_1 = arith.constant 0 : i32
    return %c0_i32, %c0_i32_0 : i32, i32
  }
  func.func @transform_5(%arg0: i32) -> (i32, i32, i32) {
    %c0_i32 = arith.constant 0 : i32
    %c0_i32_0 = arith.constant 0 : i32
    %c0_i32_1 = arith.constant 0 : i32
    %c0_i32_2 = arith.constant 0 : i32
    return %c0_i32, %c0_i32_0, %c0_i32_1 : i32, i32, i32
  }
  func.func @transform_6(%arg0: i32) -> (i32, i32) {
    %c0_i32 = arith.constant 0 : i32
    %c0_i32_0 = arith.constant 0 : i32
    return %arg0, %c0_i32 : i32, i32
  }
  func.func @transform_7(%arg0: i32) -> (i32, i32) {
    %c0_i32 = arith.constant 0 : i32
    %c0_i32_0 = arith.constant 0 : i32
    return %arg0, %c0_i32 : i32, i32
  }
}

</mosaic_0001>

<bundles_post_ra>
// kernel: tile.13
= control target key start
LH: loop header
LB: loop body
LE: loop exit
PB: predicated region body
PF: predicated region fallthrough
CT: control target
= control target key end

     0   :  { %s28_s0 = inlined_call_operand.vmem [shape: f32[8], index: 0, kind: input, shape index: {}]   ;;  %s29_s1 = inlined_call_operand.vmem [shape: f32[16,8], index: 1, kind: output, shape index: {}]  }
   0x1   :  { %v4_v0 = vld [vmem:[%s28_s0] ss:$0 sm:$0xff] }
   0x2   :  { %5 = vst [vmem:[%s29_s1] sm:$0xff] %v4_v0 }
   0x3   :  { %8 = vst [vmem:[%s29_s1 + $0x8] sm:$0xff] %v4_v0 }

// kernel: tile.14
= control target key start
LH: loop header
LB: loop body
LE: loop exit
PB: predicated region body
PF: predicated region fallthrough
CT: control target
= control target key end

     0   :  { %s131_s10 = smov 120   ;;  %s132_s11 = smov 104   ;;  %vm3_vm0 = vcmask 64512   ;;  %vm9_vm1 = vcmask 1048512   ;;  %vm15_vm2 = vcmask 982912   ;;  %vm21_vm3 = vcmask 917312   ;;  %s207_s0 = inlined_call_operand.vmem [shape: f32[16,8], index: 0, kind: input, shape index: {}]   ;;  %s208_s1 = inlined_call_operand.vmem [shape: f32[1,128], index: 1, kind: output, shape index: {}]  }
   0x1   :  { %v101_v0 = vld [vmem:[%s207_s0 + $0xf] sm:$0x1]   ;;  %v103_v1 = vld [vmem:[%s207_s0 + $0xd] sm:$0x1]   ;;  %v105_v2 = vld [vmem:[%s207_s0 + $0xb] sm:$0x1]  }
   0x2   :  { %7 = vrot.lane.b32.xlu0 %v101_v0, %s131_s10  ;;  %19 = vrot.lane.b32.xlu1 %v103_v1, %s132_s11  ;;  %s133_s14 = smov 88   ;;  %v102_v3 = vld [vmem:[%s207_s0 + $0xe] sm:$0x1]   ;;  %v104_v4 = vld [vmem:[%s207_s0 + $0xc] sm:$0x1]   ;;  %s134_s19 = smov 112  }
   0x3   :  { %31 = vrot.lane.b32.xlu2 %v105_v2, %s133_s14  ;;  %s135_s20 = smov 96   ;;  %v106_v5 = vld [vmem:[%s207_s0 + $0xa] sm:$0x1]   ;;  %s136_s23 = smov 80   ;;  %v107_v6 = vld [vmem:[%s207_s0 + $0x9] sm:$0x1]  }
   0x4   :  { %v108_v7 = vld [vmem:[%s207_s0 + $0x8] sm:$0x1]   ;;  %s137_s28 = smov 72   ;;  %s138_s29 = smov 64   ;;  %v109_v8 = vld [vmem:[%s207_s0 + $0x7] sm:$0x1]  }
   0x5   :  { %s139_s3 = smov 56   ;;  %v110_v9 = vld [vmem:[%s207_s0 + $0x6] sm:$0x1]   ;;  %v111_v10 = vld [vmem:[%s207_s0 + $0x5] sm:$0x1]   ;;  %s140_s8 = smov 48  }
   0x6   :  { %s141_s9 = smov 40   ;;  %v112_v11 = vld [vmem:[%s207_s0 + $0x4] sm:$0x1]   ;;  %s142_s12 = smov 32   ;;  %v113_v12 = vld [vmem:[%s207_s0 + $0x3] sm:$0x1]  }
   0x7   :  { %v114_v13 = vld [vmem:[%s207_s0 + $0x2] sm:$0x1]   ;;  %s143_s17 = smov 24   ;;  %s144_s18 = smov 16   ;;  %v115_v14 = vld [vmem:[%s207_s0 + $0x1] sm:$0x1]  }
   0x8   :  { %s145_s21 = smov 8   ;;  %v2_v15 = vld [vmem:[%s207_s0] sm:$0x1]   ;;  %vm27_vm4 = vcmask 851712   ;;  %vm33_vm5 = vcmask 786112   ;;  %vm39_vm6 = vcmask 720512  }
   0x9   :  { %4 = vst.msk [vmem:[#allocation0] sm:$0x1] %vm3_vm0, %v2_v15   ;;  %vm45_vm7 = vcmask 654912   ;;  %vm51_vm8 = vcmask 589312   ;;  %vm57_vm9 = vcmask 523712   ;;  %vm63_vm10 = vcmask 458112  }
   0xa   :  { %13 = vrot.lane.b32.xlu0 %v102_v3, %s134_s19  ;;  %25 = vrot.lane.b32.xlu1 %v104_v4, %s135_s20  ;;  %vm69_vm11 = vcmask 392512   ;;  %vm75_vm12 = vcmask 326912   ;;  %vm81_vm13 = vcmask 261312   ;;  %vm87_vm14 = vcmask 195712  }
   0xb   :  { %37 = vrot.lane.b32.xlu2 %v106_v5, %s136_s23  ;;  %vm93_vm15 = vcmask 130112  }
  0x12   :  { %43 = vrot.lane.b32.xlu0 %v107_v6, %s137_s28  ;;  %49 = vrot.lane.b32.xlu1 %v108_v7, %s138_s29 }
  0x13   :  { %55 = vrot.lane.b32.xlu2 %v109_v8, %s139_s3 }
  0x1a   :  { %61 = vrot.lane.b32.xlu0 %v110_v9, %s140_s8  ;;  %67 = vrot.lane.b32.xlu1 %v111_v10, %s141_s9 }
  0x1b   :  { %73 = vrot.lane.b32.xlu2 %v112_v11, %s142_s12 }
  0x22   :  { %79 = vrot.lane.b32.xlu0 %v113_v12, %s143_s17  ;;  %85 = vrot.lane.b32.xlu1 %v114_v13, %s144_s18 }
  0x23   :  { %91 = vrot.lane.b32.xlu2 %v115_v14, %s145_s21 }
  0x5d   :  { %v32_v16 = vpop.permute.xlu2 %31  }
  0x65   :  { %v38_v17 = vpop.permute.xlu2 %37  }
  0x6d   :  { %v56_v18 = vpop.permute.xlu2 %55  }
  0x74   :  { %v8_v19 = vpop.permute.xlu0 %7   ;;  %v20_v20 = vpop.permute.xlu1 %19  }
  0x75   :  { %10 = vst.msk [vmem:[#allocation0] sm:$0x1] %vm9_vm1, %v8_v19   ;;  %v74_v21 = vpop.permute.xlu2 %73  }
  0x7c   :  { %v14_v22 = vpop.permute.xlu0 %13   ;;  %v26_v23 = vpop.permute.xlu1 %25  }
  0x7d   :  { %16 = vst.msk [vmem:[#allocation0] sm:$0x1] %vm15_vm2, %v14_v22   ;;  %v92_v24 = vpop.permute.xlu2 %91  }
  0x7e   :  { %22 = vst.msk [vmem:[#allocation0] sm:$0x1] %vm21_vm3, %v20_v20  }
  0x7f   :  { %28 = vst.msk [vmem:[#allocation0] sm:$0x1] %vm27_vm4, %v26_v23  }
  0x80   :  { %34 = vst.msk [vmem:[#allocation0] sm:$0x1] %vm33_vm5, %v32_v16  }
  0x81   :  { %40 = vst.msk [vmem:[#allocation0] sm:$0x1] %vm39_vm6, %v38_v17  }
  0x84   :  { %v44_v25 = vpop.permute.xlu0 %43   ;;  %v50_v26 = vpop.permute.xlu1 %49  }
  0x85   :  { %46 = vst.msk [vmem:[#allocation0] sm:$0x1] %vm45_vm7, %v44_v25  }
  0x86   :  { %52 = vst.msk [vmem:[#allocation0] sm:$0x1] %vm51_vm8, %v50_v26  }
  0x87   :  { %58 = vst.msk [vmem:[#allocation0] sm:$0x1] %vm57_vm9, %v56_v18  }
  0x8c   :  { %v62_v27 = vpop.permute.xlu0 %61   ;;  %v68_v28 = vpop.permute.xlu1 %67  }
  0x8d   :  { %64 = vst.msk [vmem:[#allocation0] sm:$0x1] %vm63_vm10, %v62_v27  }
  0x8e   :  { %70 = vst.msk [vmem:[#allocation0] sm:$0x1] %vm69_vm11, %v68_v28  }
  0x8f   :  { %76 = vst.msk [vmem:[#allocation0] sm:$0x1] %vm75_vm12, %v74_v21  }
  0x94   :  { %v80_v29 = vpop.permute.xlu0 %79   ;;  %v86_v30 = vpop.permute.xlu1 %85  }
  0x95   :  { %82 = vst.msk [vmem:[#allocation0] sm:$0x1] %vm81_vm13, %v80_v29  }
  0x96   :  { %88 = vst.msk [vmem:[#allocation0] sm:$0x1] %vm87_vm14, %v86_v30  }
  0x97   :  { %94 = vst.msk [vmem:[#allocation0] sm:$0x1] %vm93_vm15, %v92_v24  }
  0x9e   :  { %v97_v31 = vld [vmem:[#allocation0] sm:$0x1] }
  0x9f   :  { %100 = vst [vmem:[%s208_s1] sm:$0x1] %v97_v31 }

// kernel: downsample_forward.1
= control target key start
LH: loop header
LB: loop body
LE: loop exit
PB: predicated region body
PF: predicated region fallthrough
CT: control target
= control target key end

     0   :  { %vm98_vm0 = vcmask 523264   ;;  %s1173_s1 = inlined_call_operand.vmem [shape: f32[3,64,128], index: 1, kind: input, shape index: {}]   ;;  %s1174_s0 = inlined_call_operand.vmem [shape: f32[32,64], index: 0, kind: input, shape index: {}]   ;;  %s1175_s3 = inlined_call_operand.vmem [shape: f32[1,128], index: 3, kind: input, shape index: {}]   ;;  %s1176_s2 = inlined_call_operand.vmem [shape: f32[3,128,128], index: 2, kind: input, shape index: {}]   ;;  %s1177_s4 = inlined_call_operand.vmem [shape: f32[1,128], index: 4, kind: input, shape index: {}]   ;;  %s1178_s5 = inlined_call_operand.vmem [shape: f32[2,128,64], index: 5, kind: input, shape index: {}]   ;;  %s1179_s6 = inlined_call_operand.vmem [shape: f32[32,128], index: 6, kind: output, shape index: {0}]   ;;  %s1180_s7 = inlined_call_operand.vmem [shape: f32[8,128], index: 7, kind: output, shape index: {1}]  }
   0x1   :  { %v97_v0 = vld [vmem:[%s1173_s1 + $0x38] sm:$0xff]  ;;  %v96_v3 = vld [vmem:[%s1173_s1 + $0x30] sm:$0xff]  ;;  %v95_v6 = vld [vmem:[%s1173_s1 + $0x28] sm:$0xff] }
   0x2   :  { %v612_v1 = vld [vmem:[%s1173_s1 + $0xb8] sm:$0xff]  ;;  %119 = vmatpush.msra.mxu0 %v97_v0  ;;  %v611_v4 = vld [vmem:[%s1173_s1 + $0xb0] sm:$0xff]  ;;  %v610_v7 = vld [vmem:[%s1173_s1 + $0xa8] sm:$0xff] }
   0x3   :  { %v604_v2 = vld [vmem:[%s1173_s1 + $0x78] sm:$0xff]  ;;  %166 = vmatpush.msra.mxu1 %v612_v1  ;;  %v603_v5 = vld [vmem:[%s1173_s1 + $0x70] sm:$0xff]  ;;  %v602_v8 = vld [vmem:[%s1173_s1 + $0x68] sm:$0xff] }
   0x4   :  { %237 = vmatpush.msra.mxu2 %v604_v2  ;;  %120 = vmatpush.msra.mxu0 %v96_v3  ;;  %v94_v9 = vld [vmem:[%s1173_s1 + $0x20] sm:$0xff]  ;;  %v93_v12 = vld [vmem:[%s1173_s1 + $0x18] sm:$0xff]  ;;  %v92_v15 = vld [vmem:[%s1173_s1 + $0x10] sm:$0xff] }
   0x5   :  { %167 = vmatpush.msra.mxu1 %v611_v4  ;;  %v609_v10 = vld [vmem:[%s1173_s1 + $0xa0] sm:$0xff]  ;;  %v608_v13 = vld [vmem:[%s1173_s1 + $0x98] sm:$0xff]  ;;  %v607_v16 = vld [vmem:[%s1173_s1 + $0x90] sm:$0xff] }
   0x6   :  { %238 = vmatpush.msra.mxu2 %v603_v5  ;;  %121 = vmatpush.msra.mxu0 %v95_v6  ;;  %v601_v11 = vld [vmem:[%s1173_s1 + $0x60] sm:$0xff]  ;;  %v600_v14 = vld [vmem:[%s1173_s1 + $0x58] sm:$0xff]  ;;  %v599_v17 = vld [vmem:[%s1173_s1 + $0x50] sm:$0xff] }
   0x7   :  { %168 = vmatpush.msra.mxu1 %v610_v7  ;;  %v91_v18 = vld [vmem:[%s1173_s1 + $0x8] sm:$0xff]  ;;  %v90_v21 = vld [vmem:[%s1173_s1] sm:$0xff]  ;;  %v27_v26 = vld [vmem:[%s1174_s0 + $0x10] sm:$0xff] }
   0x8   :  { %239 = vmatpush.msra.mxu2 %v602_v8  ;;  %122 = vmatpush.msra.mxu0 %v94_v9  ;;  %v606_v19 = vld [vmem:[%s1173_s1 + $0x88] sm:$0xff]  ;;  %v605_v22 = vld [vmem:[%s1173_s1 + $0x80] sm:$0xff]  ;;  %v28_v27 = vld [vmem:[%s1174_s0 + $0x18] sm:$0xff] }
   0x9   :  { %169 = vmatpush.msra.mxu1 %v609_v10  ;;  %v598_v20 = vld [vmem:[%s1173_s1 + $0x48] sm:$0xff]  ;;  %v597_v23 = vld [vmem:[%s1173_s1 + $0x40] sm:$0xff]  ;;  %v289_v28 = vld [vmem:[%s1176_s2 + $0x78] sm:$0xff]  ;;  %s675_s1 = smov 64  }
   0xa   :  { %240 = vmatpush.msra.mxu2 %v601_v11  ;;  %123 = vmatpush.msra.mxu0 %v93_v12  ;;  %v25_v24 = vld [vmem:[%s1174_s0] sm:$0xff]  ;;  %v26_v25 = vld [vmem:[%s1174_s0 + $0x8] sm:$0xff]  ;;  %v652_v29 = vld [vmem:[%s1176_s2 + $0x178] sm:$0xff] }
   0xb   :  { %170 = vmatpush.msra.mxu1 %v608_v13  ;;  %v636_v30 = vld [vmem:[%s1176_s2 + $0xf8] sm:$0xff]  ;;  %290 = vmatpush.msra.mxu3 %v289_v28  ;;  %v288_v31 = vld [vmem:[%s1176_s2 + $0x70] sm:$0xff]  ;;  %v287_v34 = vld [vmem:[%s1176_s2 + $0x68] sm:$0xff] }
   0xc   :  { %241 = vmatpush.msra.mxu2 %v600_v14  ;;  %124 = vmatpush.msra.mxu0 %v92_v15  ;;  %v651_v32 = vld [vmem:[%s1176_s2 + $0x170] sm:$0xff]  ;;  %v650_v35 = vld [vmem:[%s1176_s2 + $0x168] sm:$0xff]  ;;  %v286_v37 = vld [vmem:[%s1176_s2 + $0x60] sm:$0xff] }
   0xd   :  { %171 = vmatpush.msra.mxu1 %v607_v16  ;;  %v635_v33 = vld [vmem:[%s1176_s2 + $0xf0] sm:$0xff]  ;;  %291 = vmatpush.msra.mxu3 %v288_v31  ;;  %v634_v36 = vld [vmem:[%s1176_s2 + $0xe8] sm:$0xff]  ;;  %v649_v38 = vld [vmem:[%s1176_s2 + $0x160] sm:$0xff] }
   0xe   :  { %242 = vmatpush.msra.mxu2 %v599_v17  ;;  %125 = vmatpush.msra.mxu0 %v91_v18  ;;  %v633_v39 = vld [vmem:[%s1176_s2 + $0xe0] sm:$0xff]  ;;  %v285_v40 = vld [vmem:[%s1176_s2 + $0x58] sm:$0xff]  ;;  %v284_v43 = vld [vmem:[%s1176_s2 + $0x50] sm:$0xff]  ;;  %v29_v17 = vlaneseq }
   0xf   :  { %172 = vmatpush.msra.mxu1 %v606_v19  ;;  %292 = vmatpush.msra.mxu3 %v287_v34  ;;  %v648_v41 = vld [vmem:[%s1176_s2 + $0x158] sm:$0xff]  ;;  %v647_v44 = vld [vmem:[%s1176_s2 + $0x150] sm:$0xff]  ;;  %v283_v46 = vld [vmem:[%s1176_s2 + $0x48] sm:$0xff] }
  0x10   :  { %243 = vmatpush.msra.mxu2 %v598_v20  ;;  %126 = vmatpush.msra.mxu0 %v90_v21  ;;  %v632_v42 = vld [vmem:[%s1176_s2 + $0xd8] sm:$0xff]  ;;  %v631_v45 = vld [vmem:[%s1176_s2 + $0xd0] sm:$0xff]  ;;  %v646_v47 = vld [vmem:[%s1176_s2 + $0x148] sm:$0xff]  ;;  %v958_v19 = vshrl.u32 %v29_v17, 7 }
  0x11   :  { %173 = vmatpush.msra.mxu1 %v605_v22  ;;  %593 = vmatmul.msk.f32.vlgmr.msra.gmra.mxu0 %vm98_vm0, %v25_v24  ;;  %v630_v48 = vld [vmem:[%s1176_s2 + $0xc8] sm:$0xff]  ;;  %v282_v49 = vld [vmem:[%s1176_s2 + $0x40] sm:$0xff]  ;;  %v281_v52 = vld [vmem:[%s1176_s2 + $0x38] sm:$0xff] }
  0x12   :  { %244 = vmatpush.msra.mxu2 %v597_v23  ;;  %613 = vmatmul.msk.f32.vlgmr.msra.gmra.mxu1 %vm98_vm0, %v25_v24  ;;  %v645_v50 = vld [vmem:[%s1176_s2 + $0x140] sm:$0xff]  ;;  %v644_v53 = vld [vmem:[%s1176_s2 + $0x138] sm:$0xff]  ;;  %v280_v55 = vld [vmem:[%s1176_s2 + $0x30] sm:$0xff]  ;;  %v31_v20 = vadd.s32 8, %v958_v19  ;;  %v38_v21 = vand.u32 15, %v958_v19  ;;  %vm212_vm2 = vcmp.lt.s32.totalorder %v958_v19, 7 }
  0x13   :  { %617 = vmatmul.msk.f32.vlgmr.msra.gmra.mxu2 %vm98_vm0, %v25_v24  ;;  %353 = vmatpush.msrb.mxu0 %v652_v29  ;;  %v629_v51 = vld [vmem:[%s1176_s2 + $0xc0] sm:$0xff]  ;;  %v628_v54 = vld [vmem:[%s1176_s2 + $0xb8] sm:$0xff]  ;;  %v643_v56 = vld [vmem:[%s1176_s2 + $0x130] sm:$0xff]  ;;  %vm191_vm3 = vcmp.lt.s32.totalorder %v958_v19, 1 }
  0x14   :  { %406 = vmatpush.msrb.mxu1 %v636_v30  ;;  %293 = vmatpush.msra.mxu3 %v286_v37  ;;  %v627_v57 = vld [vmem:[%s1176_s2 + $0xb0] sm:$0xff]  ;;  %v279_v58 = vld [vmem:[%s1176_s2 + $0x28] sm:$0xff]  ;;  %v278_v61 = vld [vmem:[%s1176_s2 + $0x20] sm:$0xff]  ;;  %v45_v24 = vand.u32 15, %v31_v20  ;;  %vm962_vm1 = vcmp.eq.s32.totalorder %v38_v21, 0  ;;  %v32_v37 = vadd.s32 16, %v958_v19 }
  0x15   :  { %354 = vmatpush.msrb.mxu0 %v651_v32  ;;  %v642_v59 = vld [vmem:[%s1176_s2 + $0x128] sm:$0xff]  ;;  %v641_v62 = vld [vmem:[%s1176_s2 + $0x120] sm:$0xff]  ;;  %v277_v0 = vld [vmem:[%s1176_s2 + $0x18] sm:$0xff] }
  0x16   :  { %407 = vmatpush.msrb.mxu1 %v635_v33  ;;  %294 = vmatpush.msra.mxu3 %v285_v40  ;;  %v626_v60 = vld [vmem:[%s1176_s2 + $0xa8] sm:$0xff]  ;;  %v625_v63 = vld [vmem:[%s1176_s2 + $0xa0] sm:$0xff]  ;;  %v640_v1 = vld [vmem:[%s1176_s2 + $0x118] sm:$0xff]  ;;  %vm973_vm4 = vcmp.eq.s32.totalorder %v45_v24, 15 }
  0x17   :  { %355 = vmatpush.msrb.mxu0 %v650_v35  ;;  %v624_v2 = vld [vmem:[%s1176_s2 + $0x98] sm:$0xff]  ;;  %v276_v4 = vld [vmem:[%s1176_s2 + $0x10] sm:$0xff]  ;;  %v275_v8 = vld [vmem:[%s1176_s2 + $0x8] sm:$0xff] }
  0x18   :  { %408 = vmatpush.msrb.mxu1 %v634_v36  ;;  %295 = vmatpush.msra.mxu3 %v284_v43  ;;  %v639_v5 = vld [vmem:[%s1176_s2 + $0x110] sm:$0xff]  ;;  %v638_v9 = vld [vmem:[%s1176_s2 + $0x108] sm:$0xff]  ;;  %v274_v11 = vld [vmem:[%s1176_s2] sm:$0xff] }
  0x19   :  { %594 = vmatmul.msk.f32.gmra.mxu0 %vm98_vm0, %v26_v25  ;;  %v623_v6 = vld [vmem:[%s1176_s2 + $0x90] sm:$0xff]  ;;  %v622_v10 = vld [vmem:[%s1176_s2 + $0x88] sm:$0xff]  ;;  %v637_v12 = vld [vmem:[%s1176_s2 + $0x100] sm:$0xff] }
  0x1a   :  { %614 = vmatmul.msk.f32.gmra.mxu1 %vm98_vm0, %v26_v25  ;;  %356 = vmatpush.msrb.mxu0 %v649_v38  ;;  %v621_v13 = vld [vmem:[%s1176_s2 + $0x80] sm:$0xff]  ;;  %v667_v20 = vld [vmem:[%s1178_s5 + $0xd8] sm:$0xff]  ;;  %v473_v24 = vld [vmem:[%s1178_s5 + $0x48] sm:$0xff] }
  0x1b   :  { %618 = vmatmul.msk.f32.gmra.mxu2 %vm98_vm0, %v26_v25  ;;  %409 = vmatpush.msrb.mxu1 %v633_v39  ;;  %v668_v17 = vld [vmem:[%s1178_s5 + $0xe0] sm:$0xff] }
  0x1c   :  { %357 = vmatpush.msrb.mxu0 %v648_v41  ;;  %296 = vmatpush.msra.mxu3 %v283_v46  ;;  %v673_v41 = vld [vmem:[%s1175_s3] ss:$0 sm:$0xff]  ;;  %v52_v46 = vand.u32 15, %v32_v37  ;;  %v469_v37 = vld [vmem:[%s1178_s5 + $0x28] sm:$0xff] }
  0x1d   :  { %410 = vmatpush.msrb.mxu1 %v632_v42 }
  0x1e   :  { %358 = vmatpush.msrb.mxu0 %v647_v44  ;;  %297 = vmatpush.msra.mxu3 %v282_v49  ;;  %vm989_vm5 = vcmp.eq.s32.totalorder %v52_v46, 0  ;;  %v658_v46 = vld [vmem:[%s1178_s5 + $0x90] sm:$0xff] }
  0x1f   :  { %411 = vmatpush.msrb.mxu1 %v631_v45 }
  0x20   :  { %359 = vmatpush.msrb.mxu0 %v646_v47  ;;  %298 = vmatpush.msra.mxu3 %v281_v52 }
  0x21   :  { %595 = vmatmul.msk.f32.gmra.mxu0 %vm98_vm0, %v27_v26  ;;  %412 = vmatpush.msrb.mxu1 %v630_v48 }
  0x22   :  { %615 = vmatmul.msk.f32.gmra.mxu1 %vm98_vm0, %v27_v26  ;;  %360 = vmatpush.msrb.mxu0 %v645_v50 }
  0x23   :  { %619 = vmatmul.msk.f32.gmra.mxu2 %vm98_vm0, %v27_v26  ;;  %413 = vmatpush.msrb.mxu1 %v629_v51 }
  0x24   :  { %361 = vmatpush.msrb.mxu0 %v644_v53  ;;  %299 = vmatpush.msra.mxu3 %v280_v55  ;;  %v33_v55 = vadd.s32 24, %v958_v19 }
  0x25   :  { %414 = vmatpush.msrb.mxu1 %v628_v54 }
  0x26   :  { %362 = vmatpush.msrb.mxu0 %v643_v56  ;;  %300 = vmatpush.msra.mxu3 %v279_v58 }
  0x27   :  { %415 = vmatpush.msrb.mxu1 %v627_v57 }
  0x28   :  { %363 = vmatpush.msrb.mxu0 %v642_v59  ;;  %301 = vmatpush.msra.mxu3 %v278_v61  ;;  %v59_v61 = vand.u32 15, %v33_v55 }
  0x29   :  { %596 = vmatmul.msk.f32.gmra.mxu0 %vm98_vm0, %v28_v27  ;;  %416 = vmatpush.msrb.mxu1 %v626_v60 }
  0x2a   :  { %616 = vmatmul.msk.f32.gmra.mxu1 %vm98_vm0, %v28_v27  ;;  %364 = vmatpush.msrb.mxu0 %v641_v62  ;;  %vm1002_vm6 = vcmp.eq.s32.totalorder %v59_v61, 15 }
  0x2b   :  { %620 = vmatmul.msk.f32.gmra.mxu2 %vm98_vm0, %v28_v27  ;;  %417 = vmatpush.msrb.mxu1 %v625_v63 }
  0x2c   :  { %302 = vmatpush.msra.mxu3 %v277_v0  ;;  %365 = vmatpush.msrb.mxu0 %v640_v1 }
  0x2d   :  { %418 = vmatpush.msrb.mxu1 %v624_v2 }
  0x2e   :  { %303 = vmatpush.msra.mxu3 %v276_v4  ;;  %366 = vmatpush.msrb.mxu0 %v639_v5 }
  0x2f   :  { %419 = vmatpush.msrb.mxu1 %v623_v6 }
  0x30   :  { %304 = vmatpush.msra.mxu3 %v275_v8  ;;  %367 = vmatpush.msrb.mxu0 %v638_v9 }
  0x31   :  { %420 = vmatpush.msrb.mxu1 %v622_v10  ;;  %v479_v10 = vld [vmem:[%s1178_s5 + $0x78] sm:$0xff] }
  0x32   :  { %305 = vmatpush.msra.mxu3 %v274_v11  ;;  %368 = vmatpush.msrb.mxu0 %v637_v12  ;;  %v671_v11 = vld [vmem:[%s1178_s5 + $0xf8] sm:$0xff]  ;;  %v478_v12 = vld [vmem:[%s1178_s5 + $0x70] sm:$0xff] }
  0x33   :  { %421 = vmatpush.msrb.mxu1 %v621_v13  ;;  %480 = vmatpush.msrb.mxu2 %v479_v10  ;;  %v670_v13 = vld [vmem:[%s1178_s5 + $0xf0] sm:$0xff] }
  0x34   :  { %538 = vmatpush.msra.mxu0 %v479_v10  ;;  %517 = vmatpush.msrb.mxu3 %v671_v11 }
  0x35   :  { %558 = vmatpush.msra.mxu1 %v671_v11  ;;  %481 = vmatpush.msrb.mxu2 %v478_v12 }
  0x36   :  { %539 = vmatpush.msra.mxu0 %v478_v12  ;;  %518 = vmatpush.msrb.mxu3 %v670_v13 }
  0x37   :  { %559 = vmatpush.msra.mxu1 %v670_v13 }
  0x8e   :  { %v128_v3 = vpop.f32.mrf.mxu0 }
  0x8f   :  { %v938_v7 = vpop.f32.mrf.mxu1  ;;  %v187_v27 = vrot.slane %v128_v3, 7 }
  0x90   :  { %v208_v31 = vrot.slane %v938_v7, 1 }
  0x96   :  { %v131_v14 = vpop.f32.mrf.mxu0  ;;  %v246_v16 = vpop.f32.mrf.mxu2 }
  0x97   :  { %v178_v15 = vpop.f32.mrf.mxu1  ;;  %v188_v33 = vrot.slane %v131_v14, 7  ;;  %v477_v14 = vld [vmem:[%s1178_s5 + $0x68] sm:$0xff] }
  0x98   :  { %v209_v28 = vrot.slane %v178_v15, 1  ;;  %v669_v15 = vld [vmem:[%s1178_s5 + $0xe8] sm:$0xff]  ;;  %540 = vmatpush.msra.mxu0 %v477_v14  ;;  %482 = vmatpush.msrb.mxu2 %v477_v14 }
  0x99   :  { %v194_v42 = vsel %vm191_vm3, %v187_v27, %v188_v33  ;;  %560 = vmatpush.msra.mxu1 %v669_v15  ;;  %519 = vmatpush.msrb.mxu3 %v669_v15 }
  0x9a   :  { %v215_v39 = vsel %vm212_vm2, %v208_v31, %v209_v28 }
  0x9b   :  { %561 = vmatpush.msra.mxu1 %v668_v17  ;;  %520 = vmatpush.msrb.mxu3 %v668_v17 }
  0x9d   :  { %562 = vmatpush.msra.mxu1 %v667_v20  ;;  %521 = vmatpush.msrb.mxu3 %v667_v20 }
  0x9e   :  { %v134_v18 = vpop.f32.mrf.mxu0  ;;  %v249_v23 = vpop.f32.mrf.mxu2 }
  0x9f   :  { %v181_v22 = vpop.f32.mrf.mxu1  ;;  %v250_v44 = vadd.f32 %v249_v23, %v194_v42  ;;  %v189_v45 = vrot.slane %v134_v18, 7  ;;  %v475_v18 = vld [vmem:[%s1178_s5 + $0x58] sm:$0xff]  ;;  %v666_v23 = vld [vmem:[%s1178_s5 + $0xd0] sm:$0xff] }
  0xa0   :  { %v210_v29 = vrot.slane %v181_v22, 1  ;;  %v474_v22 = vld [vmem:[%s1178_s5 + $0x50] sm:$0xff]  ;;  %563 = vmatpush.msra.mxu1 %v666_v23  ;;  %522 = vmatpush.msrb.mxu3 %v666_v23  ;;  %v659_v42 = vld [vmem:[%s1178_s5 + $0x98] sm:$0xff] }
  0xa1   :  { %v193_v54 = vsel %vm191_vm3, %v188_v33, %v189_v45 }
  0xa2   :  { %v214_v36 = vsel %vm212_vm2, %v209_v28, %v210_v29  ;;  %v206_v57 = vsel %vm989_vm5, 0.0, %v193_v54  ;;  %v472_v28 = vld [vmem:[%s1178_s5 + $0x40] sm:$0xff] }
  0xa3   :  { %v226_v43 = vsel %vm973_vm4, 0.0, %v214_v36  ;;  %v662_v36 = vld [vmem:[%s1178_s5 + $0xb0] sm:$0xff] }
  0xa4   :  { %v259_v51 = vadd.f32 %v250_v44, %v226_v43 }
  0xa6   :  { %v137_v26 = vpop.f32.mrf.mxu0  ;;  %v252_v49 = vpop.f32.mrf.mxu2  ;;  %v267_v56 = vadd.f32 %v673_v41, %v259_v51  ;;  %v657_v51 = vld [vmem:[%s1178_s5 + $0x88] sm:$0xff] }
  0xa7   :  { %v190_v30 = vrot.slane %v137_v26, 7  ;;  %v184_v47 = vpop.f32.mrf.mxu1  ;;  %v253_v59 = vadd.f32 %v252_v49, %v206_v57  ;;  %v665_v26 = vld [vmem:[%s1178_s5 + $0xc8] sm:$0xff]  ;;  %v464_v57 = vld [vmem:[%s1178_s5] sm:$0xff] }
  0xa8   :  { %v211_v52 = vrot.slane %v184_v47, 1  ;;  %v271_v62 = vmax.f32 %v267_v56, 0.0  ;;  %564 = vmatpush.msra.mxu1 %v665_v26  ;;  %523 = vmatpush.msrb.mxu3 %v665_v26 }
  0xa9   :  { %v195_v32 = vsel %vm191_vm3, %v190_v30, %v187_v27  ;;  %v192_v0 = vsel %vm191_vm3, %v189_v45, %v190_v30  ;;  %v466_v45 = vld [vmem:[%s1178_s5 + $0x10] sm:$0xff] }
  0xaa   :  { %v204_v34 = vsel %vm962_vm1, 0.0, %v195_v32  ;;  %v213_v58 = vsel %vm212_vm2, %v210_v29, %v211_v52  ;;  %v216_v2 = vsel %vm212_vm2, %v211_v52, %v208_v31  ;;  %v664_v29 = vld [vmem:[%s1178_s5 + $0xc0] sm:$0xff]  ;;  %v471_v31 = vld [vmem:[%s1178_s5 + $0x38] sm:$0xff] }
  0xab   :  { %v247_v38 = vadd.f32 %v246_v16, %v204_v34  ;;  %v260_v60 = vadd.f32 %v253_v59, %v213_v58  ;;  %v228_v5 = vsel %vm1002_vm6, 0.0, %v216_v2  ;;  %v476_v16 = vld [vmem:[%s1178_s5 + $0x60] sm:$0xff]  ;;  %565 = vmatpush.msra.mxu1 %v664_v29  ;;  %524 = vmatpush.msrb.mxu3 %v664_v29  ;;  %v663_v32 = vld [vmem:[%s1178_s5 + $0xb8] sm:$0xff]  ;;  %v470_v34 = vld [vmem:[%s1178_s5 + $0x30] sm:$0xff] }
  0xac   :  { %541 = vmatpush.msra.mxu0 %v476_v16  ;;  %483 = vmatpush.msrb.mxu2 %v476_v16  ;;  %v656_v58 = vld [vmem:[%s1178_s5 + $0x80] sm:$0xff] }
  0xad   :  { %v258_v40 = vadd.f32 %v247_v38, %v215_v39  ;;  %v268_v4 = vadd.f32 %v673_v41, %v260_v60  ;;  %566 = vmatpush.msra.mxu1 %v663_v32  ;;  %525 = vmatpush.msrb.mxu3 %v663_v32  ;;  %v661_v38 = vld [vmem:[%s1178_s5 + $0xa8] sm:$0xff]  ;;  %v468_v39 = vld [vmem:[%s1178_s5 + $0x20] sm:$0xff] }
  0xae   :  { %v255_v63 = vpop.f32.mrf.mxu2  ;;  %542 = vmatpush.msra.mxu0 %v475_v18  ;;  %484 = vmatpush.msrb.mxu2 %v475_v18  ;;  %v674_v60 = vld [vmem:[%s1177_s4] ss:$0 sm:$0xff] }
  0xaf   :  { %v266_v48 = vadd.f32 %v673_v41, %v258_v40  ;;  %v256_v3 = vadd.f32 %v255_v63, %v192_v0  ;;  %v272_v7 = vmax.f32 %v268_v4, 0.0  ;;  %567 = vmatpush.msra.mxu1 %v662_v36  ;;  %526 = vmatpush.msrb.mxu3 %v662_v36  ;;  %v660_v40 = vld [vmem:[%s1178_s5 + $0xa0] sm:$0xff] }
  0xb0   :  { %543 = vmatpush.msra.mxu0 %v474_v22  ;;  %485 = vmatpush.msrb.mxu2 %v474_v22 }
  0xb1   :  { %v270_v50 = vmax.f32 %v266_v48, 0.0  ;;  %v261_v6 = vadd.f32 %v256_v3, %v228_v5  ;;  %568 = vmatpush.msra.mxu1 %v661_v38  ;;  %527 = vmatpush.msrb.mxu3 %v661_v38 }
  0xb2   :  { %544 = vmatpush.msra.mxu0 %v473_v24  ;;  %486 = vmatpush.msrb.mxu2 %v473_v24 }
  0xb3   :  { %306 = vmatmul.f32.vlgmr.msra.gmra.mxu3 %v270_v50  ;;  %369 = vmatmul.f32.vlgmr.msrb.gmra.mxu0 %v270_v50  ;;  %v269_v8 = vadd.f32 %v673_v41, %v261_v6  ;;  %v467_v41 = vld [vmem:[%s1178_s5 + $0x18] sm:$0xff] }
  0xb4   :  { %422 = vmatmul.f32.vlgmr.msrb.gmra.mxu1 %v270_v50  ;;  %545 = vmatpush.msra.mxu0 %v472_v28  ;;  %v465_v50 = vld [vmem:[%s1178_s5 + $0x8] sm:$0xff] }
  0xb5   :  { %v273_v9 = vmax.f32 %v269_v8, 0.0  ;;  %487 = vmatpush.msrb.mxu2 %v472_v28  ;;  %569 = vmatpush.msra.mxu1 %v660_v40 }
  0xb6   :  { %546 = vmatpush.msra.mxu0 %v471_v31  ;;  %528 = vmatpush.msrb.mxu3 %v660_v40 }
  0xb7   :  { %488 = vmatpush.msrb.mxu2 %v471_v31  ;;  %570 = vmatpush.msra.mxu1 %v659_v42 }
  0xb8   :  { %547 = vmatpush.msra.mxu0 %v470_v34  ;;  %529 = vmatpush.msrb.mxu3 %v659_v42 }
  0xb9   :  { %489 = vmatpush.msrb.mxu2 %v470_v34  ;;  %571 = vmatpush.msra.mxu1 %v658_v46 }
  0xba   :  { %548 = vmatpush.msra.mxu0 %v469_v37  ;;  %530 = vmatpush.msrb.mxu3 %v658_v46 }
  0xbb   :  { %309 = vmatmul.f32.gmra.mxu3 %v271_v62  ;;  %372 = vmatmul.f32.gmra.mxu0 %v271_v62 }
  0xbc   :  { %425 = vmatmul.f32.gmra.mxu1 %v271_v62  ;;  %490 = vmatpush.msrb.mxu2 %v469_v37 }
  0xbd   :  { %549 = vmatpush.msra.mxu0 %v468_v39  ;;  %572 = vmatpush.msra.mxu1 %v657_v51 }
  0xbe   :  { %491 = vmatpush.msrb.mxu2 %v468_v39  ;;  %531 = vmatpush.msrb.mxu3 %v657_v51 }
  0xbf   :  { %550 = vmatpush.msra.mxu0 %v467_v41  ;;  %573 = vmatpush.msra.mxu1 %v656_v58 }
  0xc0   :  { %492 = vmatpush.msrb.mxu2 %v467_v41  ;;  %532 = vmatpush.msrb.mxu3 %v656_v58 }
  0xc1   :  { %551 = vmatpush.msra.mxu0 %v466_v45 }
  0xc2   :  { %493 = vmatpush.msrb.mxu2 %v466_v45 }
  0xc3   :  { %312 = vmatmul.f32.gmra.mxu3 %v272_v7  ;;  %375 = vmatmul.f32.gmra.mxu0 %v272_v7 }
  0xc4   :  { %428 = vmatmul.f32.gmra.mxu1 %v272_v7  ;;  %552 = vmatpush.msra.mxu0 %v465_v50 }
  0xc5   :  { %494 = vmatpush.msrb.mxu2 %v465_v50 }
  0xc6   :  { %553 = vmatpush.msra.mxu0 %v464_v57 }
  0xc7   :  { %495 = vmatpush.msrb.mxu2 %v464_v57 }
  0xcb   :  { %315 = vmatmul.f32.gmra.mxu3 %v273_v9  ;;  %378 = vmatmul.f32.gmra.mxu0 %v273_v9 }
  0xcc   :  { %431 = vmatmul.f32.gmra.mxu1 %v273_v9 }
 0x130   :  { %v1040_v21 = vpop.f32.mrf.mxu0 }
 0x131   :  { %v1054_v27 = vpop.f32.mrf.mxu1  ;;  %v394_v11 = vrot.slane %v1040_v21, 1 }
 0x136   :  { %v1062_v30 = vpop.f32.mrf.mxu3 }
 0x137   :  { %v382_v47 = vrot.slane %v1062_v30, 7 }
 0x138   :  { %v1070_v33 = vpop.f32.mrf.mxu0 }
 0x139   :  { %v426_v43 = vpop.f32.mrf.mxu1  ;;  %v395_v52 = vrot.slane %v1070_v33, 1 }
 0x13b   :  { %v400_v24 = vsel %vm212_vm2, %v394_v11, %v395_v52 }
 0x13e   :  { %v310_v44 = vpop.f32.mrf.mxu3 }
 0x13f   :  { %v383_v48 = vrot.slane %v310_v44, 7 }
 0x140   :  { %v376_v49 = vpop.f32.mrf.mxu0 }
 0x141   :  { %v388_v54 = vsel %vm191_vm3, %v382_v47, %v383_v48  ;;  %v396_v55 = vrot.slane %v376_v49, 1  ;;  %v429_v2 = vpop.f32.mrf.mxu1 }
 0x142   :  { %v427_v56 = vadd.f32 %v426_v43, %v388_v54 }
 0x143   :  { %v399_v59 = vsel %vm212_vm2, %v395_v52, %v396_v55 }
 0x144   :  { %v403_v61 = vsel %vm973_vm4, 0.0, %v399_v59 }
 0x145   :  { %v436_v62 = vadd.f32 %v427_v56, %v403_v61 }
 0x146   :  { %v313_v63 = vpop.f32.mrf.mxu3 }
 0x147   :  { %v444_v0 = vadd.f32 %v674_v60, %v436_v62  ;;  %v384_v3 = vrot.slane %v313_v63, 7 }
 0x148   :  { %v379_v4 = vpop.f32.mrf.mxu0 }
 0x149   :  { %v448_v5 = vmax.f32 %v444_v0, 0.0  ;;  %v387_v6 = vsel %vm191_vm3, %v383_v48, %v384_v3  ;;  %v397_v7 = vrot.slane %v379_v4, 1  ;;  %v432_v53 = vpop.f32.mrf.mxu1 }
 0x14a   :  { %v392_v35 = vsel %vm989_vm5, 0.0, %v387_v6 }
 0x14b   :  { %452 = vst [vmem:[%s1179_s6 + $0x8] sm:$0xff] %v448_v5  ;;  %v430_v8 = vadd.f32 %v429_v2, %v392_v35  ;;  %v398_v9 = vsel %vm212_vm2, %v396_v55, %v397_v7  ;;  %v401_v15 = vsel %vm212_vm2, %v397_v7, %v394_v11 }
 0x14c   :  { %v405_v21 = vsel %vm1002_vm6, 0.0, %v401_v15 }
 0x14d   :  { %v437_v10 = vadd.f32 %v430_v8, %v398_v9 }
 0x14e   :  { %v316_v12 = vpop.f32.mrf.mxu3 }
 0x14f   :  { %v445_v13 = vadd.f32 %v674_v60, %v437_v10  ;;  %v385_v14 = vrot.slane %v316_v12, 7 }
 0x151   :  { %v449_v16 = vmax.f32 %v445_v13, 0.0  ;;  %v386_v17 = vsel %vm191_vm3, %v384_v3, %v385_v14  ;;  %v389_v18 = vsel %vm191_vm3, %v385_v14, %v382_v47 }
 0x152   :  { %v390_v20 = vsel %vm962_vm1, 0.0, %v389_v18  ;;  %v433_v22 = vadd.f32 %v432_v53, %v386_v17 }
 0x153   :  { %453 = vst [vmem:[%s1179_s6 + $0x10] sm:$0xff] %v449_v16  ;;  %v424_v23 = vadd.f32 %v1054_v27, %v390_v20 }
 0x154   :  { %v438_v26 = vadd.f32 %v433_v22, %v405_v21 }
 0x155   :  { %v435_v28 = vadd.f32 %v424_v23, %v400_v24 }
 0x156   :  { %v446_v29 = vadd.f32 %v674_v60, %v438_v26 }
 0x157   :  { %v443_v30 = vadd.f32 %v674_v60, %v435_v28 }
 0x158   :  { %v450_v31 = vmax.f32 %v446_v29, 0.0 }
 0x159   :  { %v447_v25 = vmax.f32 %v443_v30, 0.0 }
 0x15a   :  { %454 = vst [vmem:[%s1179_s6 + $0x18] sm:$0xff] %v450_v31 }
 0x15b   :  { %451 = vst [vmem:[%s1179_s6] sm:$0xff] %v447_v25 }
 0x162   :  { %v455_v1 = vld [vmem:[%s1179_s6] ss:$4 sm:$0xff]  ;;  %v653_v19 = vld [vmem:[%s1179_s6 + $0x1] ss:$4 sm:$0xff]  ;;  %v654_v27 = vld [vmem:[%s1179_s6 + $0x2] ss:$4 sm:$0xff] }
 0x163   :  { %v462_v32 = vmax.f32 %v455_v1, %v653_v19  ;;  %v655_v33 = vld [vmem:[%s1179_s6 + $0x3] ss:$4 sm:$0xff] }
 0x164   :  { %v463_v34 = vmax.f32 %v654_v27, %v655_v33 }
 0x165   :  { %496 = vmatmul.f32.vlgmr.msrb.gmra.mxu2 %v462_v32  ;;  %533 = vmatmul.f32.vlgmr.msrb.gmra.mxu3 %v462_v32 }
 0x166   :  { %554 = vmatmul.f32.vlgmr.msra.gmra.mxu0 %v463_v34  ;;  %574 = vmatmul.f32.vlgmr.msra.gmra.mxu1 %v463_v34 }
 0x1e3   :  { %v555_v36 = vpop.f32.mrf.mxu0  ;;  %v575_v37 = vpop.f32.mrf.mxu1 }
 0x1e4   :  { %v578_v38 = vmax.f32 %v555_v36, %v575_v37 }
 0x1e6   :  { %580 = vrot.lane.b32.xlu0 %v578_v38, %s675_s1 }
 0x1e8   :  { %v497_v39 = vpop.f32.mrf.mxu2  ;;  %v534_v40 = vpop.f32.mrf.mxu3 }
 0x1e9   :  { %v537_v41 = vmax.f32 %v497_v39, %v534_v40 }
 0x258   :  { %v581_v42 = vpop.permute.xlu0 %580 }
 0x259   :  { %v583_v43 = vsel %vm98_vm0, %v537_v41, %v581_v42 }
 0x25a   :  { %584 = vst [vmem:[%s1180_s7] sm:$0xff] %v583_v43 }

</bundles_post_ra>
